<compile_context>
chip_gen: v7x
topology: tpu7x:2x2x1
jax: 0.10.0
libtpu: 0.0.40
codegen_flags: <defaults>
</compile_context>

<pallas_src>
import jax
import jax.numpy as jnp
from jax import lax
from jax.experimental import pallas as pl
from jax.experimental.pallas import tpu as pltpu

_LANE = 128
_MIB = 1024 * 1024


def _round_up(x: int, m: int) -> int:
    return (x + m - 1) // m * m


def _sublane_align(dtype) -> int:
    # f32 -> 8, bf16/f16 -> 16, int8/fp8 -> 32 (sub-32-bit packs along sublanes).
    bits = jnp.dtype(dtype).itemsize * 8
    return max(8, 256 // bits)


def _vmem_budget_bytes() -> int:
    try:
        cap = int(pltpu.get_tpu_info().vmem_capacity_bytes)
    except Exception:
        cap = 64 * _MIB  # be conservative (v7x-sized) if the query fails
    # Leave headroom for Mosaic-internal scratch.
    return 96 * _MIB if cap >= 128 * _MIB else 48 * _MIB


def _choose_tile(dim: int, align: int, target: int) -> tuple[int, int]:
    """Pick (tile, padded_dim) with padded_dim % tile == 0 and minimal padding."""
    aligned = _round_up(dim, align)
    target = max(align, (target // align) * align)
    if aligned <= target:
        return aligned, aligned          # single block, alignment padding only
    best, t = align, target
    while t >= align:
        if aligned % t == 0:
            best = t
            break
        t -= align
    if best >= max(align, target // 8):
        return best, aligned             # good divisor: zero extra padding
    # Awkward factorization: bounded padding (< target) beats tiny tiles.
    return target, _round_up(aligned, target)


def _maybe_split(tile: int, padded: int, align: int) -> int:
    """Ensure >= 2 blocks along an axis when possible (v7x dual-TensorCore)."""
    if padded // tile > 1 or padded < 2 * align:
        return tile
    t = (padded // 2) // align * align
    while t >= align:
        if padded % t == 0:
            return t
        t -= align
    return tile


def _pad2(x: jax.Array, rows: int, cols: int) -> jax.Array:
    r, c = x.shape
    if (r, c) == (rows, cols):
        return x
    return jnp.pad(x, ((0, rows - r), (0, cols - c)))


def _dot_nt(a, b):
    # (m, k) x (n, k) -> (m, n): contract last dims of both operands so emoji
    # never needs a K x N transpose in HBM.
    return lax.dot_general(
        a, b, dimension_numbers=(((1,), (1,)), ((), ())),
        preferred_element_type=jnp.float32,
    )


def _mm_kernel_small(post_ref, emoji_ref, out_ref):
    out_ref[...] = _dot_nt(post_ref[...], emoji_ref[...]).astype(out_ref.dtype)


def _mm_kernel_direct(post_ref, emoji_ref, out_ref):
    # f32 output block is resident across K (out index_map ignores k):
    # accumulate straight into it; init fused into the first K step.
    k = pl.program_id(2)
    prod = _dot_nt(post_ref[...], emoji_ref[...])

    @pl.when(k == 0)
    def _():
        out_ref[...] = prod

    @pl.when(k > 0)
    def _():
        out_ref[...] += prod


def _mm_kernel_acc(post_ref, emoji_ref, out_ref, acc_ref):
    # Non-f32 output: f32 VMEM scratch accumulator, cast on the last K step.
    k = pl.program_id(2)
    prod = _dot_nt(post_ref[...], emoji_ref[...])

    @pl.when(k == 0)
    def _():
        acc_ref[...] = prod

    @pl.when(k > 0)
    def _():
        acc_ref[...] += prod

    @pl.when(k == pl.num_programs(2) - 1)
    def _():
        out_ref[...] = acc_ref[...].astype(out_ref.dtype)


@jax.jit
def score_dot_predicter(post: jax.Array, emoji: jax.Array) -> jax.Array:
    """Pallas TPU implementation of ScoreDotPredicter.forward: post @ emoji.T."""
    M, K = post.shape
    N, Ke = emoji.shape
    assert K == Ke, "inner dims must match"

    out_dtype = jnp.result_type(post.dtype, emoji.dtype)
    ip = jnp.dtype(post.dtype).itemsize
    ie = jnp.dtype(emoji.dtype).itemsize
    ob = jnp.dtype(out_dtype).itemsize
    sub_m = _sublane_align(post.dtype)
    sub_n = _sublane_align(emoji.dtype)
    budget = _vmem_budget_bytes()
    flops = 2 * M * N * K

    # ---------- fast path: full-K / full-N resident blocks, grid over M ------
    Kp = _round_up(K, _LANE)
    Np_f = _round_up(N, sub_n)              # tiny N padded on sublanes, not lanes
    tm_f, Mp_f = _choose_tile(M, sub_m, 512)
    tm_f = _maybe_split(tm_f, Mp_f, sub_m)
    fast_fp = 2 * (tm_f * Kp * ip + Np_f * Kp * ie + tm_f * Np_f * ob)
    if fast_fp <= min(budget // 4, 12 * _MIB):
        cost = pl.CostEstimate(
            flops=flops, transcendentals=0,
            bytes_accessed=int(Mp_f * Kp * ip + Np_f * Kp * ie + Mp_f * Np_f * ob))
        out_padded = pl.pallas_call(
            _mm_kernel_small,
            out_shape=jax.ShapeDtypeStruct((Mp_f, Np_f), out_dtype),
            grid_spec=pltpu.PrefetchScalarGridSpec(
                num_scalar_prefetch=0,
                grid=(Mp_f // tm_f,),
                in_specs=[
                    pl.BlockSpec((tm_f, Kp), lambda i: (i, 0)),
                    pl.BlockSpec((Np_f, Kp), lambda i: (0, 0)),   # emoji resident
                ],
                out_specs=pl.BlockSpec((tm_f, Np_f), lambda i: (i, 0)),
            ),
            compiler_params=pltpu.CompilerParams(
                dimension_semantics=("parallel",),
                vmem_limit_bytes=int(min(budget, max(16 * _MIB, 2 * fast_fp))),
            ),
            cost_estimate=cost,
        )(_pad2(post, Mp_f, Kp), _pad2(emoji, Np_f, Kp))
        return out_padded[:M, :N]

    # ---------- tiled path: (M, N, K) grid, reduction axis last --------------
    tm, Mp = _choose_tile(M, sub_m, 512)
    tn, Np = _choose_tile(N, _LANE, 512)
    tk, Kp = _choose_tile(K, _LANE, 1024)
    if Mp // tm == 1 and Np // tn == 1:
        tm = _maybe_split(tm, Mp, sub_m)    # keep both v7x TensorCores busy

    direct = out_dtype == jnp.dtype(jnp.float32)
    kernel = _mm_kernel_direct if direct else _mm_kernel_acc
    scratch = [] if direct else [pltpu.VMEM((tm, tn), jnp.float32)]

    grid_m, grid_n, grid_k = Mp // tm, Np // tn, Kp // tk
    footprint = (2 * (tm * tk * ip + tn * tk * ie) + 2 * tm * tn * ob
                 + (0 if direct else tm * tn * 4))
    vmem_limit = int(min(budget, max(32 * _MIB, 2 * footprint)))
    cost = pl.CostEstimate(
        flops=flops, transcendentals=0,
        bytes_accessed=int(grid_n * Mp * Kp * ip + grid_m * Np * Kp * ie
                           + Mp * Np * ob))

    out_padded = pl.pallas_call(
        kernel,
        out_shape=jax.ShapeDtypeStruct((Mp, Np), out_dtype),
        grid_spec=pltpu.PrefetchScalarGridSpec(
            num_scalar_prefetch=0,
            grid=(grid_m, grid_n, grid_k),
            in_specs=[
                pl.BlockSpec((tm, tk), lambda i, j, k: (i, k)),
                pl.BlockSpec((tn, tk), lambda i, j, k: (j, k)),   # emoji (N, K)
            ],
            out_specs=pl.BlockSpec((tm, tn), lambda i, j, k: (i, j)),
            scratch_shapes=scratch,
        ),
        compiler_params=pltpu.CompilerParams(
            dimension_semantics=("parallel", "parallel", "arbitrary"),
            vmem_limit_bytes=vmem_limit,
        ),
        cost_estimate=cost,
    )(_pad2(post, Mp, Kp), _pad2(emoji, Np, Kp))

    return out_padded[:M, :N]


if __name__ == "__main__":
    key = jax.random.PRNGKey(0)
    k1, k2, k3, k4, k5, k6 = jax.random.split(key, 6)

    # Module-implied small shapes: post (seq=8, hidden=32), emoji (num_emoji=4, hidden=32).
    M, K, N = 8, 32, 4
    post = jax.random.normal(k1, (M, K), dtype=jnp.float32)
    emoji = jax.random.normal(k2, (N, K), dtype=jnp.float32)
    out = jax.block_until_ready(score_dot_predicter(post, emoji))
    ref = post @ emoji.T
    assert out.shape == (M, N)
    assert jnp.allclose(out, ref, atol=1e-5, rtol=1e-5), "mismatch (small fast path)"

    # Non-aligned medium shape (exercises alignment-only padding + multi-M-block fast path).
    M2, K2, N2 = 300, 640, 200
    post2 = jax.random.normal(k3, (M2, K2), dtype=jnp.float32)
    emoji2 = jax.random.normal(k4, (N2, K2), dtype=jnp.float32)
    out2 = jax.block_until_ready(score_dot_predicter(post2, emoji2))
    ref2 = post2 @ emoji2.T
    assert out2.shape == (M2, N2)
    assert jnp.allclose(out2, ref2, atol=1e-3, rtol=1e-4), "mismatch (medium)"

    # Larger shape that takes the tiled 3-D grid path (K accumulation, lane-dense output).
    M3, K3, N3 = 512, 2048, 640
    post3 = jax.random.normal(k5, (M3, K3), dtype=jnp.float32)
    emoji3 = jax.random.normal(k6, (N3, K3), dtype=jnp.float32)
    out3 = jax.block_until_ready(score_dot_predicter(post3, emoji3))
    ref3 = post3 @ emoji3.T
    assert out3.shape == (M3, N3)
    assert jnp.allclose(out3, ref3, atol=1e-2, rtol=1e-3), "mismatch (tiled)"

    print("KERNEL_OK")
</pallas_src>

<mosaic_0001>
module attributes {stable_mosaic.version = 11 : i64} {
  func.func @_mm_kernel_small(%arg0: i32, %arg1: memref<8x128xf32, #tpu.memory_space<vmem>>, %arg2: memref<8x128xf32, #tpu.memory_space<vmem>>, %arg3: memref<8x8xf32, #tpu.memory_space<vmem>>) attributes {dimension_semantics = [#tpu.dimension_semantics<parallel>], iteration_bounds = array<i64: 1>, scalar_prefetch = 0 : i64, scratch_operands = 0 : i64, tpu.core_type = #tpu.core_type<tc>, window_params = [{transform_indices = @transform_0, window_bounds = array<i64: 8, 128>}, {pipeline_mode = #tpu.pipeline_mode<synchronous>, transform_indices = @transform_1, window_bounds = array<i64: 8, 128>}, {transform_indices = @transform_2, window_bounds = array<i64: 8, 8>}]} {
    %c0 = arith.constant 0 : index
    %c0_0 = arith.constant 0 : index
    %0 = vector.load %arg1[%c0, %c0_0] : memref<8x128xf32, #tpu.memory_space<vmem>>, vector<8x128xf32>
    %c0_1 = arith.constant 0 : index
    %c0_2 = arith.constant 0 : index
    %1 = vector.load %arg2[%c0_1, %c0_2] : memref<8x128xf32, #tpu.memory_space<vmem>>, vector<8x128xf32>
    %cst = arith.constant dense<0.000000e+00> : vector<8x8xf32>
    %2 = tpu.matmul %0, %1, %cst {dimension_numbers = #tpu.dot_dimension_numbers<[1], [1], [0], [0], [0, 0, 1, 0], [], []>} : vector<8x128xf32>, vector<8x128xf32>, vector<8x8xf32> -> vector<8x8xf32>
    %c0_3 = arith.constant 0 : index
    %c0_4 = arith.constant 0 : index
    %3 = vector.load %arg3[%c0_3, %c0_4] : memref<8x8xf32, #tpu.memory_space<vmem>>, vector<8x8xf32>
    tpu.vector_store %arg3[%c0_3, %c0_4], %2 {strides = array<i32>} : memref<8x8xf32, #tpu.memory_space<vmem>>, vector<8x8xf32>,
    return
  }
  func.func @transform_0(%arg0: i32) -> (i32, i32) {
    %c0_i32 = arith.constant 0 : i32
    %c0_i32_0 = arith.constant 0 : i32
    return %arg0, %c0_i32 : i32, i32
  }
  func.func @transform_1(%arg0: i32) -> (i32, i32) {
    %c0_i32 = arith.constant 0 : i32
    %c0_i32_0 = arith.constant 0 : i32
    %c0_i32_1 = arith.constant 0 : i32
    return %c0_i32, %c0_i32_0 : i32, i32
  }
  func.func @transform_2(%arg0: i32) -> (i32, i32) {
    %c0_i32 = arith.constant 0 : i32
    %c0_i32_0 = arith.constant 0 : i32
    return %arg0, %c0_i32 : i32, i32
  }
}

</mosaic_0001>

<bundles_post_ra>
// kernel: score_dot_predicter.1
= control target key start
LH: loop header
LB: loop body
LE: loop exit
PB: predicated region body
PF: predicated region fallthrough
CT: control target
= control target key end

     0   :  { %v98_v0 = vmov 0.0   ;;  %vm99_vm0 = vmmov 0   ;;  %vm83_vm1 = vcmask 64512   ;;  %s124_s1 = inlined_call_operand.vmem [shape: f32[8,128], index: 1, kind: input, shape index: {}]   ;;  %s125_s0 = inlined_call_operand.vmem [shape: f32[8,128], index: 0, kind: input, shape index: {}]   ;;  %s126_s2 = inlined_call_operand.vmem [shape: f32[8,8], index: 2, kind: output, shape index: {}]  }
   0x1   :  { %91 = vmatprep.subr.mxu0 %v98_v0  ;;  %v12_v1 = vld [vmem:[%s124_s1] sm:$0xff]  ;;  %93 = vmatprep.mubr.msk.f32.mxu0 %vm99_vm0, %v98_v0 }
   0x2   :  { %92 = vmatpush3.xpose.msra.mxu0 %v12_v1  ;;  %v11_v2 = vld [vmem:[%s125_s0] sm:$0xff] }
   0x5   :  { %94 = vmatmul.mubr.f32.vlgmr.msra.gmra.mrb[0].mxu0 %v11_v2 }
  0xd8   :  { %v79_v3 = vpop.f32.mrb[0].mxu0 }
  0xd9   :  { %84 = vst.msk [vmem:[%s126_s2] sm:$0xff] %vm83_vm1, %v79_v3  ;;  %v95_v4 = vpop.f32.mrb[1].mxu0 }

</bundles_post_ra>
